<compile_context>
chip_gen: v7x
topology: tpu7x:2x2x1
jax: 0.10.0
libtpu: 0.0.40
codegen_flags: <defaults>
</compile_context>

<pallas_src>
import math

import jax
import jax.numpy as jnp
from jax.experimental import pallas as pl
from jax.experimental.pallas import tpu as pltpu


# ----------------------------------------------------------------------------
# Kernel: one (t-tile, hw-tile) grid step -> (t_blk, 2F, hw_blk) output tile.
#   yx_ref: (2F, hw_blk)      combined spatial table (pos_y | pos_x), channels-first
#   z_ref : (t_blk, 2F, 1)    pos_z rows for this t-tile
# out[t, c, hw] = yx[c, hw] + z[t, c]   (pure broadcast add, lane-dense store)
# ----------------------------------------------------------------------------
def _pos_embed_sine3d_kernel(yx_ref, z_ref, out_ref):
    out_ref[...] = yx_ref[...][None, :, :] + z_ref[...]


_BLOCK_CAP_BYTES = 8 << 20  # ~8 MiB output blocks: amortizes per-step overhead
                            # (~0.35us) and keeps the double-buffered footprint
                            # well under v7x's 64 MiB physical VMEM.


def _choose_hw_block(HW, C2):
    """Lane-dense tile of the flattened H*W minor dim."""
    per_t_bytes = C2 * HW * 4
    if per_t_bytes <= _BLOCK_CAP_BYTES or HW % 128 != 0:
        # Full minor dim (always legal for BlockSpec; lane-dense because it is
        # the full array dim).
        # TODO(synk): if HW is both huge and not a multiple of 128 we cannot
        # tile the minor dim lane-densely; fall back to full-HW blocks.
        return HW
    best = 128
    blk = 128
    while blk <= HW:
        if HW % blk == 0 and C2 * blk * 4 <= _BLOCK_CAP_BYTES:
            best = blk
        blk += 128
    return best


def _choose_t_block(T, per_t_block_bytes):
    """Largest divisor of T fitting the block cap, keeping >=2 grid steps on
    the parallel t-axis when T >= 2 (v7x has two TensorCores)."""
    best = 1
    for d in range(1, T + 1):
        if T % d:
            continue
        if d * per_t_block_bytes > _BLOCK_CAP_BYTES:
            break
        if T >= 2 and T // d < 2:
            continue
        best = d
    return best


def position_embedding_sine3d(x, num_pos_feats=64, temperature=10000,
                              normalize=False, scale=None):
    """JAX/Pallas equivalent of PositionEmbeddingSine3D.forward(x, mask=None,
    fmt='btchw').  x: (B, T, C, H, W); returns (B, T, 2*num_pos_feats, H, W) f32."""
    if scale is not None and not normalize:
        raise ValueError('normalize should be True if scale is passed')
    if scale is None:
        scale = 2 * math.pi

    B, T, _, H, W = x.shape
    F_ = int(num_pos_feats)
    C2 = 2 * F_
    HW = H * W
    eps = 1e-6

    # --- tiny per-axis tables (parameter-free glue, plain JAX) ---------------
    j = jnp.arange(F_, dtype=jnp.float32)
    dim_t = temperature ** (2.0 * jnp.floor(j / 2.0) / F_)            # (F,)
    jz = jnp.arange(C2, dtype=jnp.float32)
    dim_t_z = temperature ** (2.0 * jnp.floor(jz / 2.0) / C2)         # (2F,)

    y = jnp.arange(1, H + 1, dtype=jnp.float32)                       # cumsum of ones
    xw = jnp.arange(1, W + 1, dtype=jnp.float32)
    z = jnp.arange(1, T + 1, dtype=jnp.float32)
    if normalize:
        y = y / (float(H) + eps) * float(scale)
        xw = xw / (float(W) + eps) * float(scale)
        z = z / (float(T) + eps) * float(scale)

    # sin on even channels, cos on odd (dim_t[2i] == dim_t[2i+1], so the
    # PyTorch stack/flatten interleave is equivalent to a per-channel select).
    sin_f = (jnp.arange(F_) % 2 == 0)                                 # (F,)
    sin_z = (jnp.arange(C2) % 2 == 0)                                 # (2F,)

    ang_y = y[:, None] / dim_t[None, :]                               # (H, F)
    ang_x = xw[:, None] / dim_t[None, :]                              # (W, F)
    ang_z = z[:, None] / dim_t_z[None, :]                             # (T, 2F)

    pos_y = jnp.where(sin_f, jnp.sin(ang_y), jnp.cos(ang_y))          # (H, F)
    pos_x = jnp.where(sin_f, jnp.sin(ang_x), jnp.cos(ang_x))          # (W, F)
    pos_z = jnp.where(sin_z, jnp.sin(ang_z), jnp.cos(ang_z))          # (T, 2F)

    # Channels-first tables; combined (2F, H*W) spatial table so the kernel
    # writes the final layout with a single broadcast add (no in-kernel
    # reshape/transpose, no post-kernel transpose).
    yT = jnp.concatenate([pos_y.T, jnp.zeros((F_, H), jnp.float32)], axis=0)   # (2F, H)
    xT = jnp.concatenate([jnp.zeros((F_, W), jnp.float32), pos_x.T], axis=0)   # (2F, W)
    yx_tab = (yT[:, :, None] + xT[:, None, :]).reshape(C2, HW)                 # (2F, H*W)
    z_tab = pos_z.reshape(T, C2, 1)                                            # (T, 2F, 1)

    # --- tiling ---------------------------------------------------------------
    hw_blk = _choose_hw_block(HW, C2)
    t_blk = _choose_t_block(T, C2 * hw_blk * 4)
    grid = (T // t_blk, HW // hw_blk)

    out_block_bytes = t_blk * C2 * hw_blk * 4
    yx_block_bytes = C2 * hw_blk * 4
    z_block_bytes = t_blk * C2 * 4
    vmem_limit = int(min(
        max(2 * (out_block_bytes + yx_block_bytes + z_block_bytes) + (4 << 20),
            32 << 20),
        60 << 20))

    pos_tc_hw = pl.pallas_call(
        _pos_embed_sine3d_kernel,
        out_shape=jax.ShapeDtypeStruct((T, C2, HW), jnp.float32),
        grid=grid,
        in_specs=[
            pl.BlockSpec((C2, hw_blk), lambda ti, hwi: (0, hwi)),
            pl.BlockSpec((t_blk, C2, 1), lambda ti, hwi: (ti, 0, 0)),
        ],
        out_specs=pl.BlockSpec((t_blk, C2, hw_blk),
                               lambda ti, hwi: (ti, 0, hwi)),
        compiler_params=pltpu.CompilerParams(
            dimension_semantics=("parallel", "parallel"),
            vmem_limit_bytes=vmem_limit),
        cost_estimate=pl.CostEstimate(
            flops=2 * T * C2 * HW,
            transcendentals=0,
            bytes_accessed=T * C2 * HW * 4 + C2 * HW * 4 + T * C2 * 4),
    )(yx_tab, z_tab)

    # Free, layout-preserving reshape to PyTorch's (T, 2F, H, W); B broadcast
    # stays lazy (the kernel output is provably identical across b).
    pos_tchw = pos_tc_hw.reshape(T, C2, H, W)
    return jnp.broadcast_to(pos_tchw[None], (B, T, C2, H, W))


# ----------------------------------------------------------------------------
# Pure-JAX reference mirroring the PyTorch code (mask=None, fmt='btchw').
# ----------------------------------------------------------------------------
def _reference(x, num_pos_feats=64, temperature=10000, normalize=False,
               scale=None):
    if scale is None:
        scale = 2 * math.pi
    B, T, _, H, W = x.shape
    not_mask = jnp.ones((B, T, H, W), jnp.float32)
    z_embed = jnp.cumsum(not_mask, axis=1)
    y_embed = jnp.cumsum(not_mask, axis=2)
    x_embed = jnp.cumsum(not_mask, axis=3)
    if normalize:
        eps = 1e-6
        z_embed = z_embed / (z_embed[:, -1:, :, :] + eps) * scale
        y_embed = y_embed / (y_embed[:, :, -1:, :] + eps) * scale
        x_embed = x_embed / (x_embed[:, :, :, -1:] + eps) * scale
    F_ = num_pos_feats
    dim_t = temperature ** (
        2.0 * jnp.floor(jnp.arange(F_, dtype=jnp.float32) / 2.0) / F_)
    dim_t_z = temperature ** (
        2.0 * jnp.floor(jnp.arange(2 * F_, dtype=jnp.float32) / 2.0) / (2 * F_))
    pos_x = x_embed[..., None] / dim_t
    pos_y = y_embed[..., None] / dim_t
    pos_z = z_embed[..., None] / dim_t_z

    def interleave(p):
        s = jnp.stack((jnp.sin(p[..., 0::2]), jnp.cos(p[..., 1::2])), axis=5)
        return s.reshape(p.shape[:4] + (-1,))

    pos = jnp.concatenate((interleave(pos_y), interleave(pos_x)), axis=4) \
        + interleave(pos_z)
    return jnp.transpose(pos, (0, 1, 4, 2, 3))


if __name__ == "__main__":
    key = jax.random.PRNGKey(0)
    B, T, C, H, W = 2, 4, 4, 16, 16
    num_pos_feats = 64  # module default -> output channels = 128
    x = jax.random.normal(key, (B, T, C, H, W), dtype=jnp.float32)

    ok = True
    for normalize in (False, True):
        out = position_embedding_sine3d(x, num_pos_feats=num_pos_feats,
                                        normalize=normalize)
        out = jax.block_until_ready(out)
        ref = _reference(x, num_pos_feats=num_pos_feats, normalize=normalize)
        assert out.shape == (B, T, 2 * num_pos_feats, H, W), out.shape
        if not jnp.allclose(out, ref, atol=1e-4, rtol=1e-4):
            ok = False

    if ok:
        print("KERNEL_OK")
</pallas_src>

<mosaic_0001>
module attributes {stable_mosaic.version = 11 : i64} {
  func.func @_pos_embed_sine3d_kernel(%arg0: i32, %arg1: i32, %arg2: memref<128x256xf32, #tpu.memory_space<vmem>>, %arg3: memref<2x128x1xf32, #tpu.memory_space<vmem>>, %arg4: memref<2x128x256xf32, #tpu.memory_space<vmem>>) attributes {dimension_semantics = [#tpu.dimension_semantics<parallel>, #tpu.dimension_semantics<parallel>], iteration_bounds = array<i64: 2, 1>, scalar_prefetch = 0 : i64, scratch_operands = 0 : i64, tpu.core_type = #tpu.core_type<tc>, window_params = [{transform_indices = @transform_0, window_bounds = array<i64: 128, 256>}, {transform_indices = @transform_1, window_bounds = array<i64: 2, 128, 1>}, {transform_indices = @transform_2, window_bounds = array<i64: 2, 128, 256>}]} {
    %c0 = arith.constant 0 : index
    %c0_0 = arith.constant 0 : index
    %0 = vector.load %arg2[%c0, %c0_0] : memref<128x256xf32, #tpu.memory_space<vmem>>, vector<128x256xf32>
    %1 = vector.shape_cast %0 : vector<128x256xf32> to vector<1x128x256xf32>
    %c0_1 = arith.constant 0 : index
    %c0_2 = arith.constant 0 : index
    %c0_3 = arith.constant 0 : index
    %2 = vector.load %arg3[%c0_1, %c0_2, %c0_3] : memref<2x128x1xf32, #tpu.memory_space<vmem>>, vector<2x128x1xf32>
    %3 = vector.broadcast %1 : vector<1x128x256xf32> to vector<2x128x256xf32>
    %4 = vector.broadcast %2 : vector<2x128x1xf32> to vector<2x128x256xf32>
    %5 = arith.addf %3, %4 : vector<2x128x256xf32>
    %c0_4 = arith.constant 0 : index
    %c0_5 = arith.constant 0 : index
    %c0_6 = arith.constant 0 : index
    %6 = vector.load %arg4[%c0_4, %c0_5, %c0_6] : memref<2x128x256xf32, #tpu.memory_space<vmem>>, vector<2x128x256xf32>
    tpu.vector_store %arg4[%c0_4, %c0_5, %c0_6], %5 {strides = array<i32>} : memref<2x128x256xf32, #tpu.memory_space<vmem>>, vector<2x128x256xf32>,
    return
  }
  func.func @transform_0(%arg0: i32, %arg1: i32) -> (i32, i32) {
    %c0_i32 = arith.constant 0 : i32
    %c0_i32_0 = arith.constant 0 : i32
    return %c0_i32, %arg1 : i32, i32
  }
  func.func @transform_1(%arg0: i32, %arg1: i32) -> (i32, i32, i32) {
    %c0_i32 = arith.constant 0 : i32
    %c0_i32_0 = arith.constant 0 : i32
    %c0_i32_1 = arith.constant 0 : i32
    return %arg0, %c0_i32, %c0_i32_0 : i32, i32, i32
  }
  func.func @transform_2(%arg0: i32, %arg1: i32) -> (i32, i32, i32) {
    %c0_i32 = arith.constant 0 : i32
    %c0_i32_0 = arith.constant 0 : i32
    return %arg0, %c0_i32, %arg1 : i32, i32, i32
  }
}

</mosaic_0001>

<bundles_post_ra>
// kernel: tpu_custom_call.1
= control target key start
LH: loop header
LB: loop body
LE: loop exit
PB: predicated region body
PF: predicated region fallthrough
CT: control target
= control target key end

     0   :  { %7 = vsyncpa [#allocation3], 0  ;;  %s1263_s0 = inlined_call_operand.vmem [shape: f32[128,256], index: 0, kind: input, shape index: {}]   ;;  %s1264_s1 = inlined_call_operand.vmem [shape: f32[4,128,1], index: 1, kind: input, shape index: {}]   ;;  %s1265_s2 = inlined_call_operand.hbm [shape: f32[4,128,256], index: 2, kind: output, shape index: {}]  }
   0x1   :  { %9 = vsyncpa [#allocation3 + $0x1], 0  ;;  %s820_s9 = smov 0   ;;  %s822_s10 = smov 0  }
   0x2   :  { %s824_s11 = smov 0   ;;  %s826_s12 = smov 0  }
   0x3   :  { %s828_s13 = smov 0   ;;  %s830_s14 = smov 0  }
   0x4 LB: > { %s642_s15 = sadd.s32 4294967295, %s799_s14   ;;  %s643_s16 = sadd.s32 4294967294, %s799_s14   ;;  %s799_s14 = sphi %s830_s14, %s15_s14   ;;  %s795_s13 = sphi %s828_s13, %s1272_s13   ;;  %s791_s12 = sphi %s826_s12, %s1271_s12   ;;  %s787_s11 = sphi %s824_s11, %s1270_s11   ;;  %s783_s10 = sphi %s822_s10, %s1269_s10   ;;  %s779_s9 = sphi %s820_s9, %s1268_s9  }
   0x5   : > { %s27_s17 = sadd.s32 1, %s795_s13  ;;  %s88_s18 = sadd.s32 1, %s787_s11 }
   0x6   : > { %p29_p0 = scmp.ge.s32.totalorder %s27_s17, 2  ;;  %p98_p1 = scmp.ne.s32.totalorder %s787_s11, %s783_s10 }
   0x7   : > { %p99_p2 = scmp.eq.s32.totalorder %s642_s15, 1  ;;  %p104_p3 = scmp.ne.s32.totalorder %s783_s10, %s779_s9 }
   0x8   : > { %s1274_s17 = smov (%p29_p0, %s27_s17), 0  ;;  %p105_p5 = scmp.eq.s32.totalorder %s643_s16, 1 }
   0x9   : > { %p860_p4 = por %p99_p2, %p98_p1  ;;  %s83_s20 = ssub.s32 %s795_s13, %s1274_s17 }
   0xa   : > { %p647_p6 = scmp.ge.s32.totalorder %s799_s14, 1  ;;  %p86_p7 = scmp.eq.s32.totalorder %s83_s20, 0 }
   0xb   : > { %p867_p8 = por %p105_p5, %p104_p3  ;;  %p142_p9 = scmp.lt.s32.totalorder %s799_s14, 3 }
   0xc   : > { %s873_s22 = scalar_select %p86_p7, %s787_s11, %s88_s18  }
   0xd   : > { %p143_p10 = pnand %p647_p6, %p142_p9 }
   0xe   : > { %s649_s23 = sshll.u32 (!%p143_p10), %s791_s12, 1  ;;  %v801_v0 = vmov (!%p143_p10), 0   ;;  %s167_s28 = sand.u32 (!%p143_p10), 1, %s783_s10   ;;  %v917_v33 = vld [vmem:[%s1263_s0 + $0x20] sm:$0xff] (!%p143_p10)  ;;  %v924_v34 = vld [vmem:[%s1263_s0 + $0x28] sm:$0xff] (!%p143_p10)  ;;  %v943_v43 = vld [vmem:[%s1263_s0 + $0x30] sm:$0xff] (!%p143_p10) }
   0xf   : > { %146 = sbr.rel (%p143_p10) target bundleno = 232 (0xe8), region = 28  ;;  %720 = vset.pattern.permute.xlu1 (!%p143_p10), %v801_v0  ;;  %719 = vset.pattern.permute.xlu0 (!%p143_p10), %v801_v0  ;;  %p177_p11 = scmp.lt.s32.totalorder (!%p143_p10), %s649_s23, 3  ;;  %v929_v35 = vld [vmem:[%s1263_s0] sm:$0xff] (!%p143_p10)  ;;  %v934_v36 = vld [vmem:[%s1263_s0 + $0x8] sm:$0xff] (!%p143_p10)  ;;  %v948_v44 = vld [vmem:[%s1263_s0 + $0x38] sm:$0xff] (!%p143_p10) }
  0x10   : > { %s648_s3 = sshll.u32 (!%p143_p10), %s167_s28, 9  ;;  %v953_v45 = vld [vmem:[%s1263_s0 + $0x10] sm:$0xff] (!%p143_p10)  ;;  %v958_v46 = vld [vmem:[%s1263_s0 + $0x18] sm:$0xff] (!%p143_p10)  ;;  %v983_v55 = vld [vmem:[%s1263_s0 + $0x40] sm:$0xff] (!%p143_p10)  ;;  %s660_s30 = sshll.u32 (!%p143_p10), %s791_s12, 13 }
  0x11   : > { %s960_s29 = scalar_lea.vmem (!%p143_p10), [#allocation2], %s648_s3  ;;  %v973_v53 = vld [vmem:[%s1263_s0 + $0x50] sm:$0xff] (!%p143_p10)  ;;  %v978_v54 = vld [vmem:[%s1263_s0 + $0x58] sm:$0xff] (!%p143_p10)  ;;  %v988_v56 = vld [vmem:[%s1263_s0 + $0x48] sm:$0xff] (!%p143_p10)  ;;  %s1203_s6 = scalar_lea.hbm (!%p143_p10), %s1265_s2, %s660_s30 }
  0x12   : > { %v1001_v63 = vld [vmem:[%s1263_s0 + $0x70] sm:$0xff] (!%p143_p10)  ;;  %v1006_v0 = vld [vmem:[%s1263_s0 + $0x78] sm:$0xff] (!%p143_p10)  ;;  %s554_s3 = sshll.u32 (!%p143_p10), %s960_s29, 4  ;;  %s1217_s12 = scalar_lea.sflag (!%p143_p10), [#allocation3], %s167_s28  ;;  %s1205_s3 = int_to_ptr.vmem [resolvable:$true] %s554_s3 }
  0x13   : > { %s721_s7 = scalar_lea.vmem (!%p143_p10), %s1205_s3, 8192  ;;  %s802_s8 = smov (!%p143_p10), [#allocation2]  }
  0x14   : > { %p722_p12 = scmp.ne.s32.totalorder (!%p143_p10), %s1205_s3, %s721_s7  ;;  %s725_s15 = sshll.u32 (!%p143_p10), %s802_s8, 4  ;;  %s726_s15 = int_to_ptr.vmem [resolvable:$false] %s725_s15 }
  0x15   : > { %s727_s16 = scalar_lea.vmem (!%p143_p10), %s726_s15, 16384  ;;  %p728_p1 = scmp.lt.s32.totalorder (!%p143_p10), %s1205_s3, %s726_s15 }
  0x16   : > { %s1276_s23 = smov (!%p177_p11, %s649_s23), 3  ;;  %p723_p13 = pnand %p722_p12, %p860_p4 }
  0x17   : > { %s658_s24 = sshll.u32 %s1276_s23, 7  ;;  %p729_p2 = scmp.lt.s32.totalorder %s727_s16, %s721_s7 }
  0x18   : > { %s879_s27 = scalar_lea.vmem %s1264_s1, %s658_s24  ;;  %p724_p0 = pneg %p723_p13 }
  0x19   : > { %v219_v1 = vld [vmem:[%s879_s27 + $0x10] sm:$0xff]  ;;  %v217_v2 = vld [vmem:[%s879_s27] sm:$0xff]  ;;  %v220_v3 = vld [vmem:[%s879_s27 + $0x18] sm:$0xff]  ;;  %p730_p3 = por %p729_p2, %p728_p1 }
  0x1a   : > { %261 = vperm.xlu1 %720, %v219_v1   ;;  %251 = vperm.xlu0 %719, %v217_v2   ;;  %v218_v4 = vld [vmem:[%s879_s27 + $0x8] sm:$0xff]  ;;  %v221_v6 = vld [vmem:[%s879_s27 + $0x20] sm:$0xff]  ;;  %v224_v7 = vld [vmem:[%s879_s27 + $0x38] sm:$0xff] }
  0x1b   : > { %v222_v5 = vld [vmem:[%s879_s27 + $0x28] sm:$0xff]  ;;  %v223_v8 = vld [vmem:[%s879_s27 + $0x30] sm:$0xff]  ;;  %v225_v10 = vld [vmem:[%s879_s27 + $0x40] sm:$0xff]  ;;  %p731_p5 = pnand %p730_p3, %p724_p0 }
  0x1c   : > { %v226_v9 = vld [vmem:[%s879_s27 + $0x48] sm:$0xff]  ;;  %v228_v11 = vld [vmem:[%s879_s27 + $0x58] sm:$0xff]  ;;  %v227_v12 = vld [vmem:[%s879_s27 + $0x50] sm:$0xff] }
  0x1d   : > { %v230_v13 = vld [vmem:[%s879_s27 + $0x68] sm:$0xff]  ;;  %v229_v14 = vld [vmem:[%s879_s27 + $0x60] sm:$0xff]  ;;  %v232_v15 = vld [vmem:[%s879_s27 + $0x78] sm:$0xff] }
  0x1e   : > { %266 = vperm.xlu1 %720, %v220_v3   ;;  %256 = vperm.xlu0 %719, %v218_v4   ;;  %v231_v16 = vld [vmem:[%s879_s27 + $0x70] sm:$0xff]  ;;  %v234_v17 = vld [vmem:[%s879_s27 + $0x88] sm:$0xff]  ;;  %v233_v18 = vld [vmem:[%s879_s27 + $0x80] sm:$0xff] }
  0x1f   : > { %v236_v19 = vld [vmem:[%s879_s27 + $0x98] sm:$0xff]  ;;  %v235_v20 = vld [vmem:[%s879_s27 + $0x90] sm:$0xff]  ;;  %v238_v21 = vld [vmem:[%s879_s27 + $0xa8] sm:$0xff] }
  0x20   : > { %v237_v22 = vld [vmem:[%s879_s27 + $0xa0] sm:$0xff]  ;;  %v240_v23 = vld [vmem:[%s879_s27 + $0xb8] sm:$0xff]  ;;  %v239_v24 = vld [vmem:[%s879_s27 + $0xb0] sm:$0xff] }
  0x21   : > { %v242_v25 = vld [vmem:[%s879_s27 + $0xc8] sm:$0xff]  ;;  %v241_v26 = vld [vmem:[%s879_s27 + $0xc0] sm:$0xff]  ;;  %v244_v27 = vld [vmem:[%s879_s27 + $0xd8] sm:$0xff] }
  0x22   : > { %276 = vperm.xlu1 %720, %v222_v5   ;;  %271 = vperm.xlu0 %719, %v221_v6   ;;  %v243_v28 = vld [vmem:[%s879_s27 + $0xd0] sm:$0xff]  ;;  %v246_v29 = vld [vmem:[%s879_s27 + $0xe8] sm:$0xff]  ;;  %v245_v30 = vld [vmem:[%s879_s27 + $0xe0] sm:$0xff] }
  0x23   : > { %v248_v31 = vld [vmem:[%s879_s27 + $0xf8] sm:$0xff]  ;;  %v247_v32 = vld [vmem:[%s879_s27 + $0xf0] sm:$0xff]  ;;  %v1011_v1 = vld [vmem:[%s1263_s0 + $0x60] sm:$0xff] }
  0x24   : > { %v1016_v2 = vld [vmem:[%s1263_s0 + $0x68] sm:$0xff] }
  0x26   : > { %286 = vperm.xlu1 %720, %v224_v7   ;;  %281 = vperm.xlu0 %719, %v223_v8  }
  0x2a   : > { %296 = vperm.xlu1 %720, %v226_v9   ;;  %291 = vperm.xlu0 %719, %v225_v10   ;;  %v1029_v9 = vld [vmem:[%s1263_s0 + $0x90] sm:$0xff]  ;;  %v1034_v10 = vld [vmem:[%s1263_s0 + $0x98] sm:$0xff] }
  0x2e   : > { %306 = vperm.xlu1 %720, %v228_v11   ;;  %301 = vperm.xlu0 %719, %v227_v12   ;;  %v1039_v11 = vld [vmem:[%s1263_s0 + $0x80] sm:$0xff]  ;;  %v1044_v12 = vld [vmem:[%s1263_s0 + $0x88] sm:$0xff] }
  0x32   : > { %316 = vperm.xlu1 %720, %v230_v13   ;;  %311 = vperm.xlu0 %719, %v229_v14  }
  0x36   : > { %326 = vperm.xlu1 %720, %v232_v15   ;;  %321 = vperm.xlu0 %719, %v231_v16  }
  0x3a   : > { %336 = vperm.xlu1 %720, %v234_v17   ;;  %331 = vperm.xlu0 %719, %v233_v18  }
  0x3e   : > { %346 = vperm.xlu1 %720, %v236_v19   ;;  %341 = vperm.xlu0 %719, %v235_v20   ;;  %v1057_v19 = vld [vmem:[%s1263_s0 + $0xb0] sm:$0xff]  ;;  %v1062_v20 = vld [vmem:[%s1263_s0 + $0xb8] sm:$0xff] }
  0x42   : > { %356 = vperm.xlu1 %720, %v238_v21   ;;  %351 = vperm.xlu0 %719, %v237_v22   ;;  %v1067_v21 = vld [vmem:[%s1263_s0 + $0xa0] sm:$0xff]  ;;  %v1072_v22 = vld [vmem:[%s1263_s0 + $0xa8] sm:$0xff] }
  0x46   : > { %366 = vperm.xlu1 %720, %v240_v23   ;;  %361 = vperm.xlu0 %719, %v239_v24  }
  0x4a   : > { %376 = vperm.xlu1 %720, %v242_v25   ;;  %371 = vperm.xlu0 %719, %v241_v26  }
  0x4e   : > { %386 = vperm.xlu1 %720, %v244_v27   ;;  %381 = vperm.xlu0 %719, %v243_v28  }
  0x52   : > { %396 = vperm.xlu1 %720, %v246_v29   ;;  %391 = vperm.xlu0 %719, %v245_v30   ;;  %v1085_v29 = vld [vmem:[%s1263_s0 + $0xd0] sm:$0xff]  ;;  %v1090_v30 = vld [vmem:[%s1263_s0 + $0xd8] sm:$0xff] }
  0x56   : > { %406 = vperm.xlu1 %720, %v248_v31   ;;  %401 = vperm.xlu0 %719, %v247_v32   ;;  %v1095_v31 = vld [vmem:[%s1263_s0 + $0xc0] sm:$0xff]  ;;  %v1100_v32 = vld [vmem:[%s1263_s0 + $0xc8] sm:$0xff] }
  0x99   : > { %v262_v37 = vpop.permute.xlu1 %261  ;;  %v252_v38 = vpop.permute.xlu0 %251 }
  0x9a   : > { %v413_v39 = vadd.f32 %v262_v37, %v917_v33  ;;  %v414_v40 = vadd.f32 %v262_v37, %v924_v34  ;;  %v409_v41 = vadd.f32 %v252_v38, %v929_v35  ;;  %v410_v42 = vadd.f32 %v252_v38, %v934_v36 }
  0x9c   : > { %477 = vst [vmem:[%s960_s29 + $0x20] sm:$0xff] %v413_v39  ;;  %478 = vst [vmem:[%s960_s29 + $0x28] sm:$0xff] %v414_v40 }
  0x9d   : > { %473 = vst [vmem:[%s960_s29] sm:$0xff] %v409_v41  ;;  %474 = vst [vmem:[%s960_s29 + $0x8] sm:$0xff] %v410_v42  ;;  %v267_v47 = vpop.permute.xlu1 %266  ;;  %v257_v48 = vpop.permute.xlu0 %256 }
  0x9e   : > { %v415_v49 = vadd.f32 %v267_v47, %v943_v43  ;;  %v416_v50 = vadd.f32 %v267_v47, %v948_v44  ;;  %v411_v51 = vadd.f32 %v257_v48, %v953_v45  ;;  %v412_v52 = vadd.f32 %v257_v48, %v958_v46  ;;  %v1113_v47 = vld [vmem:[%s1263_s0 + $0xf0] sm:$0xff]  ;;  %v1118_v48 = vld [vmem:[%s1263_s0 + $0xf8] sm:$0xff] }
  0xa0   : > { %479 = vst [vmem:[%s960_s29 + $0x30] sm:$0xff] %v415_v49  ;;  %480 = vst [vmem:[%s960_s29 + $0x38] sm:$0xff] %v416_v50  ;;  %v1123_v49 = vld [vmem:[%s1263_s0 + $0xe0] sm:$0xff]  ;;  %v1128_v50 = vld [vmem:[%s1263_s0 + $0xe8] sm:$0xff] }
  0xa1   : > { %475 = vst [vmem:[%s960_s29 + $0x10] sm:$0xff] %v411_v51  ;;  %476 = vst [vmem:[%s960_s29 + $0x18] sm:$0xff] %v412_v52  ;;  %v277_v57 = vpop.permute.xlu1 %276  ;;  %v272_v58 = vpop.permute.xlu0 %271 }
  0xa2   : > { %v419_v59 = vadd.f32 %v277_v57, %v973_v53  ;;  %v420_v60 = vadd.f32 %v277_v57, %v978_v54  ;;  %v417_v61 = vadd.f32 %v272_v58, %v983_v55  ;;  %v418_v62 = vadd.f32 %v272_v58, %v988_v56 }
  0xa4   : > { %483 = vst [vmem:[%s960_s29 + $0x50] sm:$0xff] %v419_v59  ;;  %484 = vst [vmem:[%s960_s29 + $0x58] sm:$0xff] %v420_v60 }
  0xa5   : > { %481 = vst [vmem:[%s960_s29 + $0x40] sm:$0xff] %v417_v61  ;;  %482 = vst [vmem:[%s960_s29 + $0x48] sm:$0xff] %v418_v62  ;;  %v287_v3 = vpop.permute.xlu1 %286  ;;  %v282_v4 = vpop.permute.xlu0 %281 }
  0xa6   : > { %v423_v5 = vadd.f32 %v287_v3, %v1001_v63  ;;  %v424_v6 = vadd.f32 %v287_v3, %v1006_v0  ;;  %v421_v7 = vadd.f32 %v282_v4, %v1011_v1  ;;  %v422_v8 = vadd.f32 %v282_v4, %v1016_v2 }
  0xa8   : > { %487 = vst [vmem:[%s960_s29 + $0x70] sm:$0xff] %v423_v5  ;;  %488 = vst [vmem:[%s960_s29 + $0x78] sm:$0xff] %v424_v6 }
  0xa9   : > { %485 = vst [vmem:[%s960_s29 + $0x60] sm:$0xff] %v421_v7  ;;  %486 = vst [vmem:[%s960_s29 + $0x68] sm:$0xff] %v422_v8  ;;  %v297_v13 = vpop.permute.xlu1 %296  ;;  %v292_v14 = vpop.permute.xlu0 %291 }
  0xaa   : > { %v427_v15 = vadd.f32 %v297_v13, %v1029_v9  ;;  %v428_v16 = vadd.f32 %v297_v13, %v1034_v10  ;;  %v425_v17 = vadd.f32 %v292_v14, %v1039_v11  ;;  %v426_v18 = vadd.f32 %v292_v14, %v1044_v12 }
  0xac   : > { %491 = vst [vmem:[%s960_s29 + $0x90] sm:$0xff] %v427_v15  ;;  %492 = vst [vmem:[%s960_s29 + $0x98] sm:$0xff] %v428_v16 }
  0xad   : > { %489 = vst [vmem:[%s960_s29 + $0x80] sm:$0xff] %v425_v17  ;;  %490 = vst [vmem:[%s960_s29 + $0x88] sm:$0xff] %v426_v18  ;;  %v307_v23 = vpop.permute.xlu1 %306  ;;  %v302_v24 = vpop.permute.xlu0 %301 }
  0xae   : > { %v431_v25 = vadd.f32 %v307_v23, %v1057_v19  ;;  %v432_v26 = vadd.f32 %v307_v23, %v1062_v20  ;;  %v429_v27 = vadd.f32 %v302_v24, %v1067_v21  ;;  %v430_v28 = vadd.f32 %v302_v24, %v1072_v22 }
  0xb0   : > { %495 = vst [vmem:[%s960_s29 + $0xb0] sm:$0xff] %v431_v25  ;;  %496 = vst [vmem:[%s960_s29 + $0xb8] sm:$0xff] %v432_v26 }
  0xb1   : > { %493 = vst [vmem:[%s960_s29 + $0xa0] sm:$0xff] %v429_v27  ;;  %494 = vst [vmem:[%s960_s29 + $0xa8] sm:$0xff] %v430_v28  ;;  %v317_v37 = vpop.permute.xlu1 %316  ;;  %v312_v38 = vpop.permute.xlu0 %311 }
  0xb2   : > { %v435_v39 = vadd.f32 %v317_v37, %v1085_v29  ;;  %v436_v40 = vadd.f32 %v317_v37, %v1090_v30  ;;  %v433_v41 = vadd.f32 %v312_v38, %v1095_v31  ;;  %v434_v42 = vadd.f32 %v312_v38, %v1100_v32 }
  0xb4   : > { %499 = vst [vmem:[%s960_s29 + $0xd0] sm:$0xff] %v435_v39  ;;  %500 = vst [vmem:[%s960_s29 + $0xd8] sm:$0xff] %v436_v40 }
  0xb5   : > { %497 = vst [vmem:[%s960_s29 + $0xc0] sm:$0xff] %v433_v41  ;;  %498 = vst [vmem:[%s960_s29 + $0xc8] sm:$0xff] %v434_v42  ;;  %v327_v51 = vpop.permute.xlu1 %326  ;;  %v322_v52 = vpop.permute.xlu0 %321 }
  0xb6   : > { %v439_v57 = vadd.f32 %v327_v51, %v1113_v47  ;;  %v440_v58 = vadd.f32 %v327_v51, %v1118_v48  ;;  %v437_v59 = vadd.f32 %v322_v52, %v1123_v49  ;;  %v438_v60 = vadd.f32 %v322_v52, %v1128_v50 }
  0xb8   : > { %503 = vst [vmem:[%s960_s29 + $0xf0] sm:$0xff] %v439_v57  ;;  %504 = vst [vmem:[%s960_s29 + $0xf8] sm:$0xff] %v440_v58 }
  0xb9   : > { %501 = vst [vmem:[%s960_s29 + $0xe0] sm:$0xff] %v437_v59  ;;  %502 = vst [vmem:[%s960_s29 + $0xe8] sm:$0xff] %v438_v60  ;;  %v337_v61 = vpop.permute.xlu1 %336  ;;  %v332_v62 = vpop.permute.xlu0 %331 }
  0xba   : > { %v443_v3 = vadd.f32 %v337_v61, %v953_v45  ;;  %v444_v4 = vadd.f32 %v337_v61, %v958_v46  ;;  %v441_v5 = vadd.f32 %v332_v62, %v929_v35  ;;  %v442_v6 = vadd.f32 %v332_v62, %v934_v36 }
  0xbc   : > { %507 = vst [vmem:[%s960_s29 + $0x110] sm:$0xff] %v443_v3  ;;  %508 = vst [vmem:[%s960_s29 + $0x118] sm:$0xff] %v444_v4 }
  0xbd   : > { %505 = vst [vmem:[%s960_s29 + $0x100] sm:$0xff] %v441_v5  ;;  %506 = vst [vmem:[%s960_s29 + $0x108] sm:$0xff] %v442_v6  ;;  %v347_v7 = vpop.permute.xlu1 %346  ;;  %v342_v8 = vpop.permute.xlu0 %341 }
  0xbe   : > { %v447_v13 = vadd.f32 %v347_v7, %v943_v43  ;;  %v448_v45 = vadd.f32 %v347_v7, %v948_v44  ;;  %v445_v46 = vadd.f32 %v342_v8, %v917_v33  ;;  %v446_v35 = vadd.f32 %v342_v8, %v924_v34 }
  0xc0   : > { %511 = vst [vmem:[%s960_s29 + $0x130] sm:$0xff] %v447_v13  ;;  %512 = vst [vmem:[%s960_s29 + $0x138] sm:$0xff] %v448_v45 }
  0xc1   : > { %509 = vst [vmem:[%s960_s29 + $0x120] sm:$0xff] %v445_v46  ;;  %510 = vst [vmem:[%s960_s29 + $0x128] sm:$0xff] %v446_v35  ;;  %v357_v36 = vpop.permute.xlu1 %356  ;;  %v352_v14 = vpop.permute.xlu0 %351 }
  0xc2   : > { %v451_v15 = vadd.f32 %v357_v36, %v973_v53  ;;  %v452_v43 = vadd.f32 %v357_v36, %v978_v54  ;;  %v449_v44 = vadd.f32 %v352_v14, %v983_v55  ;;  %v450_v33 = vadd.f32 %v352_v14, %v988_v56 }
  0xc4   : > { %515 = vst [vmem:[%s960_s29 + $0x150] sm:$0xff] %v451_v15  ;;  %516 = vst [vmem:[%s960_s29 + $0x158] sm:$0xff] %v452_v43 }
  0xc5   : > { %513 = vst [vmem:[%s960_s29 + $0x140] sm:$0xff] %v449_v44  ;;  %514 = vst [vmem:[%s960_s29 + $0x148] sm:$0xff] %v450_v33  ;;  %v367_v34 = vpop.permute.xlu1 %366  ;;  %v362_v16 = vpop.permute.xlu0 %361 }
  0xc6   : > { %v455_v17 = vadd.f32 %v367_v34, %v1001_v63  ;;  %v456_v53 = vadd.f32 %v367_v34, %v1006_v0  ;;  %v453_v54 = vadd.f32 %v362_v16, %v1011_v1  ;;  %v454_v55 = vadd.f32 %v362_v16, %v1016_v2 }
  0xc8   : > { %519 = vst [vmem:[%s960_s29 + $0x170] sm:$0xff] %v455_v17  ;;  %520 = vst [vmem:[%s960_s29 + $0x178] sm:$0xff] %v456_v53 }
  0xc9   : > { %517 = vst [vmem:[%s960_s29 + $0x160] sm:$0xff] %v453_v54  ;;  %518 = vst [vmem:[%s960_s29 + $0x168] sm:$0xff] %v454_v55  ;;  %v377_v56 = vpop.permute.xlu1 %376  ;;  %v372_v18 = vpop.permute.xlu0 %371 }
  0xca   : > { %v459_v23 = vadd.f32 %v377_v56, %v1029_v9  ;;  %v460_v63 = vadd.f32 %v377_v56, %v1034_v10  ;;  %v457_v0 = vadd.f32 %v372_v18, %v1039_v11  ;;  %v458_v1 = vadd.f32 %v372_v18, %v1044_v12 }
  0xcc   : > { %523 = vst [vmem:[%s960_s29 + $0x190] sm:$0xff] %v459_v23  ;;  %524 = vst [vmem:[%s960_s29 + $0x198] sm:$0xff] %v460_v63 }
  0xcd   : > { %521 = vst [vmem:[%s960_s29 + $0x180] sm:$0xff] %v457_v0  ;;  %522 = vst [vmem:[%s960_s29 + $0x188] sm:$0xff] %v458_v1  ;;  %v387_v2 = vpop.permute.xlu1 %386  ;;  %v382_v24 = vpop.permute.xlu0 %381 }
  0xce   : > { %v463_v25 = vadd.f32 %v387_v2, %v1057_v19  ;;  %v464_v9 = vadd.f32 %v387_v2, %v1062_v20  ;;  %v461_v10 = vadd.f32 %v382_v24, %v1067_v21  ;;  %v462_v11 = vadd.f32 %v382_v24, %v1072_v22 }
  0xd0   : > { %527 = vst [vmem:[%s960_s29 + $0x1b0] sm:$0xff] %v463_v25  ;;  %528 = vst [vmem:[%s960_s29 + $0x1b8] sm:$0xff] %v464_v9 }
  0xd1   : > { %525 = vst [vmem:[%s960_s29 + $0x1a0] sm:$0xff] %v461_v10  ;;  %526 = vst [vmem:[%s960_s29 + $0x1a8] sm:$0xff] %v462_v11  ;;  %v397_v12 = vpop.permute.xlu1 %396  ;;  %v392_v26 = vpop.permute.xlu0 %391 }
  0xd2   : > { %v467_v27 = vadd.f32 %v397_v12, %v1085_v29  ;;  %v468_v19 = vadd.f32 %v397_v12, %v1090_v30  ;;  %v465_v28 = vadd.f32 %v392_v26, %v1095_v31  ;;  %v466_v20 = vadd.f32 %v392_v26, %v1100_v32 }
  0xd4   : > { %531 = vst [vmem:[%s960_s29 + $0x1d0] sm:$0xff] %v467_v27  ;;  %532 = vst [vmem:[%s960_s29 + $0x1d8] sm:$0xff] %v468_v19 }
  0xd5   : > { %529 = vst [vmem:[%s960_s29 + $0x1c0] sm:$0xff] %v465_v28  ;;  %530 = vst [vmem:[%s960_s29 + $0x1c8] sm:$0xff] %v466_v20  ;;  %v407_v21 = vpop.permute.xlu1 %406  ;;  %v402_v22 = vpop.permute.xlu0 %401 }
  0xd6   : > { %v471_v29 = vadd.f32 %v407_v21, %v1113_v47  ;;  %v472_v30 = vadd.f32 %v407_v21, %v1118_v48  ;;  %v469_v31 = vadd.f32 %v402_v22, %v1123_v49  ;;  %v470_v32 = vadd.f32 %v402_v22, %v1128_v50 }
  0xd8   : > { %535 = vst [vmem:[%s960_s29 + $0x1f0] sm:$0xff] %v471_v29  ;;  %536 = vst [vmem:[%s960_s29 + $0x1f8] sm:$0xff] %v472_v30 }
  0xd9   : > { %533 = vst [vmem:[%s960_s29 + $0x1e0] sm:$0xff] %v469_v31  ;;  %534 = vst [vmem:[%s960_s29 + $0x1e8] sm:$0xff] %v470_v32 }
  0xda   : > { %734 = shalt.err (!%p731_p5)
}
  0xdb   : > { %s735_s28 = scalar_lea.hbm %s1203_s6, 8192  ;;  %s739_s20 = scalar_lea.hbm %s1265_s2, 16384 }
  0xdc   : > { %p736_p6 = scmp.ne.s32.totalorder %s1203_s6, %s735_s28  ;;  %p740_p10 = scmp.lt.u32.totalorder %s1203_s6, %s1265_s2 }
  0xdd   : > { %p741_p11 = scmp.lt.u32.totalorder %s739_s20, %s735_s28  ;;  %p743_p13 = scmp.lt.u32.totalorder %s735_s28, %s1203_s6 }
  0xde   : > { %p737_p7 = pnand %p736_p6, %p860_p4 }
  0xdf   : > { %p742_p12 = por %p741_p11, %p740_p10 }
  0xe0   : > { %p738_p9 = pneg %p737_p7 }
  0xe1   : > { %p744_p0 = por %p743_p13, %p742_p12 }
  0xe3   : > { %p745_p1 = pnand %p744_p0, %p738_p9 }
  0xe5   : > { %748 = shalt.err (!%p745_p1)
}
  0xe6   : > { %s803_s25 = smov 256   ;;  %s804_s26 = smov 16  }
  0xe7   : > { %661 = dma.vmem_to_hbm [thread:$0]  (%p860_p4), %s1205_s3, 8192, %s1203_s6, %s1217_s12, %s803_s25, %s803_s25, %s804_s26  }
  0xe8 PF: > { %p667_p2 = scmp.ge.s32.totalorder %s799_s14, 2  ;;  %s569_s27 = sand.u32 1, %s779_s9  }
  0xe9   : > { %s570_s30 = scalar_lea.sflag [#allocation3], %s569_s27 }
  0xea   : > { %p664_p3 = pnand %p667_p2, %p867_p8 }
  0xec   : > { %774 = dma.done.wait (!%p664_p3), %s570_s30, 8192  }
  0xed   : > { %776 = vsyncadd (!%p664_p3), %s570_s30, 4294959104  ;;  %s15_s14 = sadd.s32 1, %s799_s14   ;;  %s1268_s9 = smov %s783_s10 }
  0xee   : > { %p12_p5 = scmp.ge.s32.totalorder %s15_s14, 4   ;;  %s1269_s10 = smov %s787_s11 }
  0xef   : > { %s1270_s11 = smov %s873_s22  ;;  %s1271_s12 = smov %s795_s13 }
  0xf0   : > { %s1272_s13 = smov %s1274_s17  ;;  %14 = sbr.rel (!%p12_p5) target bundleno = 4 (0x4), region = 66 }
  0xf7   :  { %575 = vsyncpa [#allocation3], 1 }
  0xf8   :  { %577 = vsyncpa [#allocation3 + $0x1], 1 }

</bundles_post_ra>
